<compile_context>
chip_gen: v7x
topology: tpu7x:2x2x1
jax: 0.10.0
libtpu: 0.0.40
codegen_flags: <defaults>
</compile_context>

<pallas_src>
import functools
import math

import jax
import jax.numpy as jnp
from jax.experimental import pallas as pl
from jax.experimental.pallas import tpu as pltpu


# ----------------------------- config (ModelArgs) -----------------------------
DIM = 32
N_HEADS = 4
N_KV_HEADS = 2
BATCH = 2
SEQ = 8
HEAD_DIM = DIM // N_HEADS          # 8


# ----------------------------- Pallas kernel ----------------------------------
def self_attention_kernel(x_ref, wqkv_ref, wo_ref, rope_ref, out_ref, *,
                          n_heads, n_kv_heads, head_dim):
    """One batch element per grid step.

    x_ref    : (1, S, D)              float32
    wqkv_ref : (Hq+2*Hkv, D, hd)      bfloat16  heads packed [q..., k..., v...];
                                                q/k cols permuted to [even|odd],
                                                q pre-scaled by 1/sqrt(hd)
    wo_ref   : (Hq, hd, D)            bfloat16
    rope_ref : (2, S, hd//2)          float32   [0]=cos, [1]=sin
    out_ref  : (1, S, D)              float32
    """
    S = x_ref.shape[1]
    D = x_ref.shape[2]
    n_rep = n_heads // n_kv_heads
    hd2 = head_dim // 2
    n_tot = n_heads + 2 * n_kv_heads

    x = x_ref[0]                               # (S, D) f32
    xb = x.astype(jnp.bfloat16)                # bf16 MXU inputs, f32 accumulation

    cos = rope_ref[0]                          # (S, hd/2) f32
    sin = rope_ref[1]

    # --- q/k/v projections as ONE batched dot_general over packed heads -------
    x_in = jnp.broadcast_to(xb, (n_tot, S, D))
    qkv = jnp.einsum("hsd,hdk->hsk", x_in, wqkv_ref[...],
                     preferred_element_type=jnp.float32)      # (Hq+2Hkv, S, hd)

    # --- RoPE on q and k heads together: rotate-half form in the permuted
    #     [even|odd] layout (pure VPU, no MXU / no roll) ------------------------
    qk = qkv[:n_heads + n_kv_heads]            # (Hq+Hkv, S, hd)
    t1 = qk[:, :, :hd2]                        # even (real) components
    t2 = qk[:, :, hd2:]                        # odd  (imag) components
    qk = jnp.concatenate([t1 * cos - t2 * sin,
                          t2 * cos + t1 * sin], axis=-1)

    q = qk[:n_heads]                           # (Hq,  S, hd)  pre-scaled
    k = qk[n_heads:]                           # (Hkv, S, hd)
    v = qkv[n_heads + n_kv_heads:]             # (Hkv, S, hd)

    # --- GQA: repeat kv heads to query heads (leading-dim broadcast + merge) --
    def rep_kv(t):
        if n_rep == 1:
            return t
        t = jnp.broadcast_to(t[:, None], (n_kv_heads, n_rep, S, head_dim))
        return t.reshape(n_heads, S, head_dim)

    k = rep_kv(k)
    v = rep_kv(v)

    # --- attention, all heads in one batched einsum (no mask: matches reference)
    s = jnp.einsum("hqd,hkd->hqk",
                   q.astype(jnp.bfloat16), k.astype(jnp.bfloat16),
                   preferred_element_type=jnp.float32)        # (Hq, S, S)
    s = s - jnp.max(s, axis=-1, keepdims=True)
    p = jnp.exp(s)
    p = p * pl.reciprocal(jnp.sum(p, axis=-1, keepdims=True), approx=True)

    o = jnp.einsum("hqk,hkd->hqd",
                   p.astype(jnp.bfloat16), v.astype(jnp.bfloat16),
                   preferred_element_type=jnp.float32)        # (Hq, S, hd)

    # --- output projection: per-head (hd, D) blocks of wo, summed over heads --
    proj = jnp.einsum("hqd,hdm->hqm",
                      o.astype(jnp.bfloat16), wo_ref[...],
                      preferred_element_type=jnp.float32)     # (Hq, S, D)
    out_ref[0] = jnp.sum(proj, axis=0)


# ----------------------------- wrapper -----------------------------------------
def _full_spec(arr):
    n = arr.ndim
    return pl.BlockSpec(arr.shape, lambda b, n=n: (0,) * n)


def self_attention(x, wqkv, wo3, rope_cs, *, n_heads, n_kv_heads):
    B, S, D = x.shape
    head_dim = D // n_heads
    kernel = functools.partial(self_attention_kernel, n_heads=n_heads,
                               n_kv_heads=n_kv_heads, head_dim=head_dim)
    weights = [wqkv, wo3, rope_cs]
    return pl.pallas_call(
        kernel,
        out_shape=jax.ShapeDtypeStruct((B, S, D), jnp.float32),
        grid=(B,),
        in_specs=[pl.BlockSpec((1, S, D), lambda b: (b, 0, 0))]
                 + [_full_spec(w) for w in weights],
        out_specs=pl.BlockSpec((1, S, D), lambda b: (b, 0, 0)),
        compiler_params=pltpu.CompilerParams(dimension_semantics=("parallel",)),
    )(x, *weights)


# ----------------------------- host-side packing (glue) -------------------------
def pack_weights(wq, wk, wv, wo, *, n_heads, n_kv_heads, head_dim):
    """wq/wk/wv: (D, H*hd) ; wo: (H*hd, D).

    Produces one packed bf16 per-head block array [q heads | k heads | v heads]
    of shape (Hq+2*Hkv, D, hd) with the interleaved->[even|odd] column
    permutation on q/k and 1/sqrt(hd) folded into q, plus per-head wo blocks."""
    D = wq.shape[0]
    perm = jnp.concatenate([jnp.arange(0, head_dim, 2),
                            jnp.arange(1, head_dim, 2)])
    scale = 1.0 / math.sqrt(head_dim)
    wq3 = (wq.reshape(D, n_heads, head_dim).transpose(1, 0, 2)[:, :, perm] * scale)
    wk3 = wk.reshape(D, n_kv_heads, head_dim).transpose(1, 0, 2)[:, :, perm]
    wv3 = wv.reshape(D, n_kv_heads, head_dim).transpose(1, 0, 2)
    wqkv = jnp.concatenate([wq3, wk3, wv3], axis=0).astype(jnp.bfloat16)
    wo3 = wo.reshape(n_heads, head_dim, D).astype(jnp.bfloat16)
    return wqkv, wo3


def rope_table(seq_len, head_dim, start_pos=0):
    inv = 1.0 / (10000.0 ** (jnp.arange(0, head_dim, 2, dtype=jnp.float32) / head_dim))
    m = jnp.arange(start_pos, start_pos + seq_len, dtype=jnp.float32)
    ang = jnp.outer(m, inv)                                    # (S, hd/2)
    return jnp.stack([jnp.cos(ang), jnp.sin(ang)]).astype(jnp.float32)


# ----------------------------- pure-JAX reference (torch semantics) ------------
def reference_self_attention(x, wq, wk, wv, wo, rope_cs, *, n_heads, n_kv_heads):
    B, S, D = x.shape
    hd = D // n_heads
    n_rep = n_heads // n_kv_heads
    cos, sin = rope_cs[0], rope_cs[1]

    q = (x @ wq).reshape(B, S, n_heads, hd)
    k = (x @ wk).reshape(B, S, n_kv_heads, hd)
    v = (x @ wv).reshape(B, S, n_kv_heads, hd)

    def rot(t):   # interleaved complex-pair rotation (view_as_complex math)
        tr = t.reshape(*t.shape[:-1], hd // 2, 2)
        te, to = tr[..., 0], tr[..., 1]
        c = cos[None, :, None, :]
        s = sin[None, :, None, :]
        out = jnp.stack([te * c - to * s, te * s + to * c], axis=-1)
        return out.reshape(t.shape)

    q, k = rot(q), rot(k)
    k = jnp.repeat(k, n_rep, axis=2)
    v = jnp.repeat(v, n_rep, axis=2)
    q, k, v = (jnp.swapaxes(t, 1, 2) for t in (q, k, v))       # (B, H, S, hd)
    scores = (q @ jnp.swapaxes(k, -1, -2)) / math.sqrt(hd)
    p = jax.nn.softmax(scores, axis=-1)
    o = jnp.swapaxes(p @ v, 1, 2).reshape(B, S, n_heads * hd)
    return o @ wo


# ----------------------------- main ---------------------------------------------
if __name__ == "__main__":
    key = jax.random.PRNGKey(0)
    kx, kq, kk, kv, ko = jax.random.split(key, 5)
    x = jax.random.normal(kx, (BATCH, SEQ, DIM), dtype=jnp.float32)
    wscale = DIM ** -0.5
    wq = wscale * jax.random.normal(kq, (DIM, N_HEADS * HEAD_DIM), dtype=jnp.float32)
    wk = wscale * jax.random.normal(kk, (DIM, N_KV_HEADS * HEAD_DIM), dtype=jnp.float32)
    wv = wscale * jax.random.normal(kv, (DIM, N_KV_HEADS * HEAD_DIM), dtype=jnp.float32)
    wo = wscale * jax.random.normal(ko, (N_HEADS * HEAD_DIM, DIM), dtype=jnp.float32)

    rope_cs = rope_table(SEQ, HEAD_DIM, start_pos=0)
    wqkv, wo3 = pack_weights(wq, wk, wv, wo, n_heads=N_HEADS,
                             n_kv_heads=N_KV_HEADS, head_dim=HEAD_DIM)

    out = self_attention(x, wqkv, wo3, rope_cs,
                         n_heads=N_HEADS, n_kv_heads=N_KV_HEADS)
    out = jax.block_until_ready(out)

    ref = reference_self_attention(x, wq, wk, wv, wo, rope_cs,
                                   n_heads=N_HEADS, n_kv_heads=N_KV_HEADS)

    assert out.shape == (BATCH, SEQ, DIM)
    assert out.dtype == jnp.float32
    assert bool(jnp.all(jnp.isfinite(out)))
    # bf16 MXU inputs + EUP approx reciprocal => loose tolerance vs f32 reference.
    assert bool(jnp.allclose(out, ref, rtol=1e-1, atol=3e-2)), \
        float(jnp.max(jnp.abs(out - ref)))
    print("KERNEL_OK")
</pallas_src>

<mosaic_0001>
module attributes {stable_mosaic.version = 11 : i64} {
  func.func @self_attention_kernel(%arg0: i32, %arg1: memref<1x8x32xf32, #tpu.memory_space<vmem>>, %arg2: memref<8x32x8xbf16, #tpu.memory_space<vmem>>, %arg3: memref<4x8x32xbf16, #tpu.memory_space<vmem>>, %arg4: memref<2x8x4xf32, #tpu.memory_space<vmem>>, %arg5: memref<1x8x32xf32, #tpu.memory_space<vmem>>) attributes {dimension_semantics = [#tpu.dimension_semantics<parallel>], iteration_bounds = array<i64: 2>, scalar_prefetch = 0 : i64, scratch_operands = 0 : i64, tpu.core_type = #tpu.core_type<tc>, window_params = [{transform_indices = @transform_0, window_bounds = array<i64: 1, 8, 32>}, {pipeline_mode = #tpu.pipeline_mode<synchronous>, transform_indices = @transform_1, window_bounds = array<i64: 8, 32, 8>}, {pipeline_mode = #tpu.pipeline_mode<synchronous>, transform_indices = @transform_2, window_bounds = array<i64: 4, 8, 32>}, {pipeline_mode = #tpu.pipeline_mode<synchronous>, transform_indices = @transform_3, window_bounds = array<i64: 2, 8, 4>}, {transform_indices = @transform_4, window_bounds = array<i64: 1, 8, 32>}]} {
    %c0 = arith.constant 0 : index
    %c0_0 = arith.constant 0 : index
    %c0_1 = arith.constant 0 : index
    %0 = vector.load %arg1[%c0, %c0_0, %c0_1] : memref<1x8x32xf32, #tpu.memory_space<vmem>>, vector<1x8x32xf32>
    %1 = vector.shape_cast %0 : vector<1x8x32xf32> to vector<8x32xf32>
    %2 = arith.truncf %1 : vector<8x32xf32> to vector<8x32xbf16>
    %c0_2 = arith.constant 0 : index
    %c0_3 = arith.constant 0 : index
    %c0_4 = arith.constant 0 : index
    %3 = vector.load %arg4[%c0_2, %c0_3, %c0_4] : memref<2x8x4xf32, #tpu.memory_space<vmem>>, vector<1x8x4xf32>
    %4 = vector.shape_cast %3 : vector<1x8x4xf32> to vector<8x4xf32>
    %c1 = arith.constant 1 : index
    %c0_5 = arith.constant 0 : index
    %c0_6 = arith.constant 0 : index
    %5 = vector.load %arg4[%c1, %c0_5, %c0_6] : memref<2x8x4xf32, #tpu.memory_space<vmem>>, vector<1x8x4xf32>
    %6 = vector.shape_cast %5 : vector<1x8x4xf32> to vector<8x4xf32>
    %7 = vector.shape_cast %2 : vector<8x32xbf16> to vector<1x8x32xbf16>
    %8 = vector.broadcast %7 : vector<1x8x32xbf16> to vector<8x8x32xbf16>
    %c0_7 = arith.constant 0 : index
    %c0_8 = arith.constant 0 : index
    %c0_9 = arith.constant 0 : index
    %9 = vector.load %arg2[%c0_7, %c0_8, %c0_9] : memref<8x32x8xbf16, #tpu.memory_space<vmem>>, vector<8x32x8xbf16>
    "tpu.trace_start"() <{level = 10 : i32, message = "hsd,hdk->hsk"}> : () -> ()
    %cst = arith.constant dense<0.000000e+00> : vector<8x8x8xf32>
    %10 = tpu.matmul %8, %9, %cst {dimension_numbers = #tpu.dot_dimension_numbers<[2], [1], [1], [2], [0, 0, 0, 1, 1, 2], [0], [0]>} : vector<8x8x32xbf16>, vector<8x32x8xbf16>, vector<8x8x8xf32> -> vector<8x8x8xf32>
    "tpu.trace_stop"() : () -> ()
    %11 = vector.extract_strided_slice %10 {offsets = [0, 0, 0], sizes = [6, 8, 8], strides = [1, 1, 1]} : vector<8x8x8xf32> to vector<6x8x8xf32>
    %12 = vector.extract_strided_slice %11 {offsets = [0, 0, 0], sizes = [6, 8, 4], strides = [1, 1, 1]} : vector<6x8x8xf32> to vector<6x8x4xf32>
    %13 = vector.extract_strided_slice %11 {offsets = [0, 0, 4], sizes = [6, 8, 4], strides = [1, 1, 1]} : vector<6x8x8xf32> to vector<6x8x4xf32>
    %14 = vector.shape_cast %4 : vector<8x4xf32> to vector<1x8x4xf32>
    %15 = vector.broadcast %14 : vector<1x8x4xf32> to vector<6x8x4xf32>
    %16 = arith.mulf %12, %15 : vector<6x8x4xf32>
    %17 = vector.shape_cast %6 : vector<8x4xf32> to vector<1x8x4xf32>
    %18 = vector.broadcast %17 : vector<1x8x4xf32> to vector<6x8x4xf32>
    %19 = arith.mulf %13, %18 : vector<6x8x4xf32>
    %20 = arith.subf %16, %19 : vector<6x8x4xf32>
    %21 = vector.shape_cast %4 : vector<8x4xf32> to vector<1x8x4xf32>
    %22 = vector.broadcast %21 : vector<1x8x4xf32> to vector<6x8x4xf32>
    %23 = arith.mulf %13, %22 : vector<6x8x4xf32>
    %24 = vector.shape_cast %6 : vector<8x4xf32> to vector<1x8x4xf32>
    %25 = vector.broadcast %24 : vector<1x8x4xf32> to vector<6x8x4xf32>
    %26 = arith.mulf %12, %25 : vector<6x8x4xf32>
    %27 = arith.addf %23, %26 : vector<6x8x4xf32>
    %28 = tpu.concatenate %20, %27 in 2 : vector<6x8x4xf32>, vector<6x8x4xf32> -> vector<6x8x8xf32>
    %29 = vector.extract_strided_slice %28 {offsets = [0, 0, 0], sizes = [4, 8, 8], strides = [1, 1, 1]} : vector<6x8x8xf32> to vector<4x8x8xf32>
    %30 = vector.extract_strided_slice %28 {offsets = [4, 0, 0], sizes = [2, 8, 8], strides = [1, 1, 1]} : vector<6x8x8xf32> to vector<2x8x8xf32>
    %31 = vector.extract_strided_slice %10 {offsets = [6, 0, 0], sizes = [2, 8, 8], strides = [1, 1, 1]} : vector<8x8x8xf32> to vector<2x8x8xf32>
    %32 = vector.shape_cast %30 : vector<2x8x8xf32> to vector<2x1x8x8xf32>
    %33 = vector.shape_cast %32 : vector<2x1x8x8xf32> to vector<2x1x8x8xf32>
    %34 = vector.broadcast %33 : vector<2x1x8x8xf32> to vector<2x2x8x8xf32>
    %35 = vector.shape_cast %34 : vector<2x2x8x8xf32> to vector<4x8x8xf32>
    %36 = vector.shape_cast %31 : vector<2x8x8xf32> to vector<2x1x8x8xf32>
    %37 = vector.shape_cast %36 : vector<2x1x8x8xf32> to vector<2x1x8x8xf32>
    %38 = vector.broadcast %37 : vector<2x1x8x8xf32> to vector<2x2x8x8xf32>
    %39 = vector.shape_cast %38 : vector<2x2x8x8xf32> to vector<4x8x8xf32>
    %40 = arith.truncf %29 : vector<4x8x8xf32> to vector<4x8x8xbf16>
    %41 = arith.truncf %35 : vector<4x8x8xf32> to vector<4x8x8xbf16>
    "tpu.trace_start"() <{level = 10 : i32, message = "hqd,hkd->hqk"}> : () -> ()
    %cst_10 = arith.constant dense<0.000000e+00> : vector<4x8x8xf32>
    %42 = tpu.matmul %40, %41, %cst_10 {dimension_numbers = #tpu.dot_dimension_numbers<[2], [2], [1], [1], [0, 0, 0, 1, 1, 1], [0], [0]>} : vector<4x8x8xbf16>, vector<4x8x8xbf16>, vector<4x8x8xf32> -> vector<4x8x8xf32>
    "tpu.trace_stop"() : () -> ()
    %cst_11 = arith.constant dense<0xFF800000> : vector<4x8xf32>
    %43 = vector.multi_reduction <maximumf>, %42, %cst_11 [2] : vector<4x8x8xf32> to vector<4x8xf32>
    %44 = vector.shape_cast %43 : vector<4x8xf32> to vector<4x8x1xf32>
    %45 = vector.broadcast %44 : vector<4x8x1xf32> to vector<4x8x8xf32>
    %46 = arith.subf %42, %45 : vector<4x8x8xf32>
    %47 = math.exp %46 : vector<4x8x8xf32>
    %cst_12 = arith.constant dense<0.000000e+00> : vector<4x8xf32>
    %48 = vector.multi_reduction <add>, %47, %cst_12 [2] : vector<4x8x8xf32> to vector<4x8xf32>
    %49 = vector.shape_cast %48 : vector<4x8xf32> to vector<4x8x1xf32>
    %50 = tpu.reciprocal %49 {approx = true} : vector<4x8x1xf32> -> vector<4x8x1xf32>
    %51 = vector.broadcast %50 : vector<4x8x1xf32> to vector<4x8x8xf32>
    %52 = arith.mulf %47, %51 : vector<4x8x8xf32>
    %53 = arith.truncf %52 : vector<4x8x8xf32> to vector<4x8x8xbf16>
    %54 = arith.truncf %39 : vector<4x8x8xf32> to vector<4x8x8xbf16>
    "tpu.trace_start"() <{level = 10 : i32, message = "hqk,hkd->hqd"}> : () -> ()
    %cst_13 = arith.constant dense<0.000000e+00> : vector<4x8x8xf32>
    %55 = tpu.matmul %53, %54, %cst_13 {dimension_numbers = #tpu.dot_dimension_numbers<[2], [1], [1], [2], [0, 0, 0, 1, 1, 2], [0], [0]>} : vector<4x8x8xbf16>, vector<4x8x8xbf16>, vector<4x8x8xf32> -> vector<4x8x8xf32>
    "tpu.trace_stop"() : () -> ()
    %56 = arith.truncf %55 : vector<4x8x8xf32> to vector<4x8x8xbf16>
    %c0_14 = arith.constant 0 : index
    %c0_15 = arith.constant 0 : index
    %c0_16 = arith.constant 0 : index
    %57 = vector.load %arg3[%c0_14, %c0_15, %c0_16] : memref<4x8x32xbf16, #tpu.memory_space<vmem>>, vector<4x8x32xbf16>
    "tpu.trace_start"() <{level = 10 : i32, message = "hqd,hdm->hqm"}> : () -> ()
    %cst_17 = arith.constant dense<0.000000e+00> : vector<4x8x32xf32>
    %58 = tpu.matmul %56, %57, %cst_17 {dimension_numbers = #tpu.dot_dimension_numbers<[2], [1], [1], [2], [0, 0, 0, 1, 1, 2], [0], [0]>} : vector<4x8x8xbf16>, vector<4x8x32xbf16>, vector<4x8x32xf32> -> vector<4x8x32xf32>
    "tpu.trace_stop"() : () -> ()
    %cst_18 = arith.constant dense<0.000000e+00> : vector<8x32xf32>
    %59 = vector.multi_reduction <add>, %58, %cst_18 [0] : vector<4x8x32xf32> to vector<8x32xf32>
    %c0_19 = arith.constant 0 : index
    %c0_20 = arith.constant 0 : index
    %c0_21 = arith.constant 0 : index
    %60 = vector.load %arg5[%c0_19, %c0_20, %c0_21] : memref<1x8x32xf32, #tpu.memory_space<vmem>>, vector<1x8x32xf32>
    %61 = vector.shape_cast %60 : vector<1x8x32xf32> to vector<8x32xf32>
    %62 = vector.shape_cast %59 : vector<8x32xf32> to vector<1x8x32xf32>
    tpu.vector_store %arg5[%c0_19, %c0_20, %c0_21], %62 {strides = array<i32>} : memref<1x8x32xf32, #tpu.memory_space<vmem>>, vector<1x8x32xf32>,
    return
  }
  func.func @transform_0(%arg0: i32) -> (i32, i32, i32) {
    %c0_i32 = arith.constant 0 : i32
    %c0_i32_0 = arith.constant 0 : i32
    %c0_i32_1 = arith.constant 0 : i32
    return %arg0, %c0_i32, %c0_i32_0 : i32, i32, i32
  }
  func.func @transform_1(%arg0: i32) -> (i32, i32, i32) {
    %c0_i32 = arith.constant 0 : i32
    %c0_i32_0 = arith.constant 0 : i32
    %c0_i32_1 = arith.constant 0 : i32
    %c0_i32_2 = arith.constant 0 : i32
    return %c0_i32, %c0_i32_0, %c0_i32_1 : i32, i32, i32
  }
  func.func @transform_2(%arg0: i32) -> (i32, i32, i32) {
    %c0_i32 = arith.constant 0 : i32
    %c0_i32_0 = arith.constant 0 : i32
    %c0_i32_1 = arith.constant 0 : i32
    %c0_i32_2 = arith.constant 0 : i32
    return %c0_i32, %c0_i32_0, %c0_i32_1 : i32, i32, i32
  }
  func.func @transform_3(%arg0: i32) -> (i32, i32, i32) {
    %c0_i32 = arith.constant 0 : i32
    %c0_i32_0 = arith.constant 0 : i32
    %c0_i32_1 = arith.constant 0 : i32
    %c0_i32_2 = arith.constant 0 : i32
    return %c0_i32, %c0_i32_0, %c0_i32_1 : i32, i32, i32
  }
  func.func @transform_4(%arg0: i32) -> (i32, i32, i32) {
    %c0_i32 = arith.constant 0 : i32
    %c0_i32_0 = arith.constant 0 : i32
    %c0_i32_1 = arith.constant 0 : i32
    return %arg0, %c0_i32, %c0_i32_0 : i32, i32, i32
  }
}

</mosaic_0001>

<bundles_post_ra>
// kernel: tpu_custom_call.1
= control target key start
LH: loop header
LB: loop body
LE: loop exit
PB: predicated region body
PF: predicated region fallthrough
CT: control target
= control target key end

     0   :  { %9 = vsyncpa [#allocation3], 0  ;;  %s2188_s0 = inlined_call_operand.vmem [shape: f32[2,8,32], index: 0, kind: input, shape index: {}]   ;;  %s2189_s1 = inlined_call_operand.vmem [shape: bf16[8,32,8], index: 1, kind: input, shape index: {}]   ;;  %s2190_s2 = inlined_call_operand.vmem [shape: bf16[4,8,32], index: 2, kind: input, shape index: {}]   ;;  %s2191_s3 = inlined_call_operand.vmem [shape: f32[2,8,4], index: 3, kind: input, shape index: {}]   ;;  %s2192_s4 = inlined_call_operand.hbm [shape: f32[2,8,32], index: 4, kind: output, shape index: {}]  }
   0x1   :  { %11 = vsyncpa [#allocation3 + $0x1], 0  ;;  %s1837_s15 = smov 0   ;;  %s1839_s16 = smov 0  }
   0x2   :  { %s1841_s17 = smov 0   ;;  %s1843_s18 = smov 0  }
   0x3 LB: > { %s1858_s19 = sadd.s32 4294967295, %s1805_s18   ;;  %s1437_s20 = sadd.s32 4294967294, %s1805_s18   ;;  %s1805_s18 = sphi %s1843_s18, %s2198_s18   ;;  %s1801_s17 = sphi %s1841_s17, %s2197_s17   ;;  %s1797_s16 = sphi %s1839_s16, %s2196_s16   ;;  %s1793_s15 = sphi %s1837_s15, %s2195_s15  }
   0x4   : > { %s1862_s21 = sadd.s32 1, %s1805_s18   ;;  %s113_s22 = sadd.s32 1, %s1801_s17 }
   0x5   : > { %s110_s23 = ssub.s32 %s1805_s18, %s1862_s21  ;;  %p123_p0 = scmp.ne.s32.totalorder %s1801_s17, %s1797_s16 }
   0x6   : > { %p111_p1 = scmp.eq.s32.totalorder %s110_s23, 0  ;;  %p124_p2 = scmp.eq.s32.totalorder %s1858_s19, 1 }
   0x7   : > { %p129_p3 = scmp.ne.s32.totalorder %s1797_s16, %s1793_s15  ;;  %p130_p4 = scmp.eq.s32.totalorder %s1437_s20, 1 }
   0x8   : > { %s1873_s24 = scalar_select %p111_p1, %s1801_s17, %s113_s22  }
   0x9   : > { %p1875_p5 = por %p124_p2, %p123_p0  ;;  %p1879_p6 = por %p130_p4, %p129_p3 }
   0xa   : > { %p1440_p7 = scmp.ge.s32.totalorder %s1805_s18, 1  ;;  %p164_p8 = scmp.lt.s32.totalorder %s1805_s18, 3 }
   0xc   : > { %p165_p9 = pnand %p1440_p7, %p164_p8 }
   0xd   : > { %v1711_v0 = vld [vmem:[%s2189_s1] sm:$0xff] (!%p165_p9)   ;;  %v1807_v1 = vmov (!%p165_p9), 0.0   ;;  %v1712_v2 = vld [vmem:[%s2189_s1 + $0x10] sm:$0xff] (!%p165_p9)   ;;  %v1713_v3 = vld [vmem:[%s2189_s1 + $0x8] sm:$0xff] (!%p165_p9)   ;;  %vm1808_vm0 = vmmov (!%p165_p9), 0   ;;  %p189_p10 = scmp.lt.s32.totalorder (!%p165_p9), %s1858_s19, 1 }
   0xe   : > { %168 = sbr.rel (%p165_p9) target bundleno = 1373 (0x55d), region = 36  ;;  %1532 = vmatprep.subr.bf16.mxu0 (!%p165_p9), %v1807_v1  ;;  %1540 = vmatprep.subr.bf16.mxu1 (!%p165_p9), %v1807_v1  ;;  %v1714_v4 = vld [vmem:[%s2189_s1 + $0x18] sm:$0xff] (!%p165_p9)   ;;  %v1715_v5 = vld [vmem:[%s2189_s1 + $0x20] sm:$0xff] (!%p165_p9)   ;;  %v1716_v6 = vld [vmem:[%s2189_s1 + $0x30] sm:$0xff] (!%p165_p9)   ;;  %vm243_vm1 = vcmask (!%p165_p9), 261120   ;;  %s1809_s7 = smov (!%p165_p9), 4  }
   0xf   : > { %1533 = vmatpush3.bf16.msra.mxu0 (!%p165_p9), %v1711_v0  ;;  %1536 = vmatprep.mubr.msk.bf16.mxu0 (!%p165_p9), %vm1808_vm0, %v1807_v1  ;;  %v1717_v9 = vld [vmem:[%s2189_s1 + $0x28] sm:$0xff] (!%p165_p9)   ;;  %v1718_v10 = vld [vmem:[%s2189_s1 + $0x38] sm:$0xff] (!%p165_p9)   ;;  %v1719_v12 = vld [vmem:[%s2189_s1 + $0x40] sm:$0xff] (!%p165_p9)   ;;  %s1810_s5 = smov (!%p165_p9), 124   ;;  %vm743_vm2 = vcmask (!%p165_p9), 31744   ;;  %vm756_vm3 = vcmask (!%p165_p9), 64512  }
  0x10   : > { %1541 = vmatpush3.bf16.msra.mxu1 (!%p165_p9), %v1712_v2  ;;  %1534 = vmatprep.subr.bf16.mxu0 (!%p165_p9), %v1807_v1  ;;  %v1933_v11 = vld [vmem:[%s2191_s3 + $0x8] sm:$0xff] (!%p165_p9)  ;;  %v1720_v13 = vld [vmem:[%s2189_s1 + $0x50] sm:$0xff] (!%p165_p9)   ;;  %v1722_v15 = vld [vmem:[%s2189_s1 + $0x58] sm:$0xff] (!%p165_p9)   ;;  %vm988_vm4 = vcmask (!%p165_p9), 1043456   ;;  %s186_s27 = sand.u32 (!%p165_p9), 1, %s1797_s16   ;;  %s1481_s29 = sshll.u32 (!%p165_p9), %s1858_s19, 7 }
  0x11   : > { %1542 = vmatprep.subr.bf16.mxu1 (!%p165_p9), %v1807_v1  ;;  %1544 = vmatprep.mubr.msk.bf16.mxu1 (!%p165_p9), %vm1808_vm0, %v1807_v1  ;;  %v1721_v14 = vld [vmem:[%s2189_s1 + $0x48] sm:$0xff] (!%p165_p9)   ;;  %v1964_v16 = vld [vmem:[%s2191_s3] sm:$0xff] (!%p165_p9)  ;;  %v1724_v26 = vld [vmem:[%s2189_s1 + $0x70] sm:$0xff] (!%p165_p9)   ;;  %s1441_s28 = sshll.u32 (!%p165_p9), %s186_s27, 3 }
  0x12   : > { %658 = vrot.lane.b32.xlu0 (!%p165_p9), %v1933_v11, %s1809_s7  ;;  %v1723_v25 = vld [vmem:[%s2189_s1 + $0x60] sm:$0xff] (!%p165_p9)   ;;  %v1725_v30 = vld [vmem:[%s2189_s1 + $0x68] sm:$0xff] (!%p165_p9)   ;;  %v1726_v31 = vld [vmem:[%s2189_s1 + $0x78] sm:$0xff] (!%p165_p9)   ;;  %s188_s30 = scalar_lea.vmem (!%p165_p9), [#allocation2], %s1441_s28 }
  0x13   : > { %1535 = vmatpush3.bf16.msra.mxu0 (!%p165_p9), %v1713_v3 }
  0x14   : > { %1543 = vmatpush3.bf16.msra.mxu1 (!%p165_p9), %v1714_v4  ;;  %1548 = vmatprep.subr.bf16.mxu0 (!%p165_p9), %v1807_v1 }
  0x15   : > { %s190_s9 = scalar_select %p189_p10, %s1858_s19, 1  ;;  %1556 = vmatprep.subr.bf16.mxu1 %v1807_v1 }
  0x16   : > { %698 = vrot.lane.b32.xlu0 %v1964_v16, %s1809_s7  ;;  %s1365_s19 = scalar_lea.sflag [#allocation3], %s186_s27 }
  0x17   : > { %s1442_s10 = sshll.u32 %s190_s9, 3  ;;  %s2145_s9 = scalar_lea.hbm %s2192_s4, %s1481_s29 }
  0x18   : > { %s192_s20 = scalar_lea.vmem %s2188_s0, %s1442_s10 }
  0x19   : > { %v194_v7 = vld [vmem:[%s192_s20] sm:$0xff] }
  0x1a   : > { %v1918_v8 = vpack.c.bf16 %v194_v7, %v194_v7 }
  0x1c   : > { %1537 = vmatmul.mubr.msk.bf16.vlgmr.msra.gmra.mrb[0].mxu0 %vm243_vm1, %v1918_v8  ;;  %1545 = vmatmul.mubr.msk.bf16.vlgmr.msra.gmra.mrb[0].mxu1 %vm243_vm1, %v1918_v8 }
  0x1d   : > { %1549 = vmatpush3.bf16.msra.mxu0 %v1715_v5  ;;  %1557 = vmatpush3.bf16.msra.mxu1 %v1716_v6 }
  0x1e   : > { %1550 = vmatprep.subr.bf16.mxu0 %v1807_v1  ;;  %1558 = vmatprep.subr.bf16.mxu1 %v1807_v1 }
  0x1f   : > { %1552 = vmatprep.mubr.msk.bf16.mxu0 %vm1808_vm0, %v1807_v1  ;;  %1560 = vmatprep.mubr.msk.bf16.mxu1 %vm1808_vm0, %v1807_v1 }
  0x21   : > { %1551 = vmatpush3.bf16.msra.mxu0 %v1717_v9  ;;  %1559 = vmatpush3.bf16.msra.mxu1 %v1718_v10 }
  0x22   : > { %1564 = vmatprep.subr.bf16.mxu0 %v1807_v1  ;;  %1572 = vmatprep.subr.bf16.mxu1 %v1807_v1 }
  0x24   : > { %1553 = vmatmul.mubr.msk.bf16.vlgmr.msra.gmra.mrb[4].mxu0 %vm243_vm1, %v1918_v8  ;;  %1561 = vmatmul.mubr.msk.bf16.vlgmr.msra.gmra.mrb[4].mxu1 %vm243_vm1, %v1918_v8 }
  0x25   : > { %1565 = vmatpush3.bf16.msra.mxu0 %v1719_v12  ;;  %1573 = vmatpush3.bf16.msra.mxu1 %v1720_v13 }
  0x26   : > { %1566 = vmatprep.subr.bf16.mxu0 %v1807_v1  ;;  %1574 = vmatprep.subr.bf16.mxu1 %v1807_v1 }
  0x27   : > { %1568 = vmatprep.mubr.msk.bf16.mxu0 %vm1808_vm0, %v1807_v1  ;;  %1576 = vmatprep.mubr.msk.bf16.mxu1 %vm1808_vm0, %v1807_v1 }
  0x29   : > { %1567 = vmatpush3.bf16.msra.mxu0 %v1721_v14  ;;  %1575 = vmatpush3.bf16.msra.mxu1 %v1722_v15 }
  0x2a   : > { %1580 = vmatprep.subr.bf16.mxu0 %v1807_v1  ;;  %1588 = vmatprep.subr.bf16.mxu1 %v1807_v1 }
  0x2c   : > { %1569 = vmatmul.mubr.msk.bf16.vlgmr.msra.gmra.mrb[8].mxu0 %vm243_vm1, %v1918_v8  ;;  %1577 = vmatmul.mubr.msk.bf16.vlgmr.msra.gmra.mrb[8].mxu1 %vm243_vm1, %v1918_v8 }
  0x2d   : > { %1584 = vmatprep.mubr.msk.bf16.mxu0 %vm1808_vm0, %v1807_v1  ;;  %1592 = vmatprep.mubr.msk.bf16.mxu1 %vm1808_vm0, %v1807_v1 }
  0x2e   : > { %1581 = vmatpush3.bf16.msra.mxu0 %v1723_v25  ;;  %1589 = vmatpush3.bf16.msra.mxu1 %v1724_v26 }
  0x2f   : > { %1582 = vmatprep.subr.bf16.mxu0 %v1807_v1  ;;  %1590 = vmatprep.subr.bf16.mxu1 %v1807_v1 }
  0x32   : > { %1583 = vmatpush3.bf16.msra.mxu0 %v1725_v30  ;;  %1591 = vmatpush3.bf16.msra.mxu1 %v1726_v31 }
  0x33   : > { %1596 = vmatprep.subr.bf16.mxu0 %v1807_v1  ;;  %1602 = vmatprep.subr.bf16.mxu1 %v1807_v1 }
  0x35   : > { %1585 = vmatmul.mubr.msk.bf16.vlgmr.msra.gmra.mrb[12].mxu0 %vm243_vm1, %v1918_v8  ;;  %1593 = vmatmul.mubr.msk.bf16.vlgmr.msra.gmra.mrb[12].mxu1 %vm243_vm1, %v1918_v8 }
  0x36   : > { %1598 = vmatprep.mubr.msk.bf16.mxu0 %vm1808_vm0, %v1807_v1  ;;  %1604 = vmatprep.mubr.msk.bf16.mxu1 %vm1808_vm0, %v1807_v1 }
  0x84   : > { %v659_v17 = vpop.permute.xlu0 %658 }
  0x88   : > { %v699_v58 = vpop.permute.xlu0 %698 }
  0xef   : > { %v1984_v18 = vpop.f32.mrb[0].mxu0  ;;  %v1986_v19 = vpop.f32.mrb[0].mxu1 }
  0xf0   : > { %v1538_v20 = vpop.f32.mrb[1].mxu0  ;;  %v661_v21 = vmul.f32 %v659_v17, %v1984_v18  ;;  %v1546_v22 = vpop.f32.mrb[1].mxu1  ;;  %v707_v29 = vmul.f32 %v1933_v11, %v1984_v18  ;;  %v662_v32 = vmul.f32 %v659_v17, %v1986_v19  ;;  %v708_v55 = vmul.f32 %v1933_v11, %v1986_v19 }
  0xf1   : > { %v284_v23 = vpop.f32.mrb[2].mxu0  ;;  %v336_v24 = vpop.f32.mrb[2].mxu1  ;;  %v701_v4 = vmul.f32 %v699_v58, %v1984_v18  ;;  %v651_v8 = vmul.f32 %v1984_v18, %v1964_v16  ;;  %v652_v18 = vmul.f32 %v1986_v19, %v1964_v16 }
  0xf2   : > { %673 = vrot.lane.b32.xlu0 %v661_v21, %s1810_s5  ;;  %v1539_v27 = vpop.f32.mrb[3].mxu0  ;;  %v1547_v28 = vpop.f32.mrb[3].mxu1  ;;  %v702_v23 = vmul.f32 %v699_v58, %v1986_v19 }
  0xf6   : > { %719 = vrot.lane.b32.xlu0 %v707_v29, %s1809_s7 }
  0xf7   : > { %v2008_v33 = vpop.f32.mrb[4].mxu0  ;;  %v2010_v34 = vpop.f32.mrb[4].mxu1 }
  0xf8   : > { %v1554_v35 = vpop.f32.mrb[5].mxu0  ;;  %v1562_v36 = vpop.f32.mrb[5].mxu1  ;;  %v663_v41 = vmul.f32 %v659_v17, %v2008_v33  ;;  %v664_v42 = vmul.f32 %v659_v17, %v2010_v34  ;;  %v709_v56 = vmul.f32 %v1933_v11, %v2008_v33  ;;  %v710_v57 = vmul.f32 %v1933_v11, %v2010_v34 }
  0xf9   : > { %v388_v37 = vpop.f32.mrb[6].mxu0  ;;  %v440_v38 = vpop.f32.mrb[6].mxu1  ;;  %v653_v31 = vmul.f32 %v2008_v33, %v1964_v16  ;;  %v703_v35 = vmul.f32 %v699_v58, %v2008_v33  ;;  %v704_v33 = vmul.f32 %v699_v58, %v2010_v34 }
  0xfa   : > { %675 = vrot.lane.b32.xlu0 %v662_v32, %s1810_s5  ;;  %v1555_v39 = vpop.f32.mrb[7].mxu0  ;;  %v1563_v40 = vpop.f32.mrb[7].mxu1 }
  0xfb   : > { %v654_v40 = vmul.f32 %v2010_v34, %v1964_v16 }
  0xfe   : > { %677 = vrot.lane.b32.xlu0 %v663_v41, %s1810_s5 }
  0xff   : > { %v489_v43 = vpop.f32.mrb[8].mxu0  ;;  %v541_v44 = vpop.f32.mrb[8].mxu1 }
 0x100   : > { %v1570_v45 = vpop.f32.mrb[9].mxu0  ;;  %v665_v46 = vmul.f32 %v659_v17, %v489_v43  ;;  %v1578_v47 = vpop.f32.mrb[9].mxu1  ;;  %v711_v52 = vmul.f32 %v1933_v11, %v489_v43  ;;  %v666_v53 = vmul.f32 %v659_v17, %v541_v44  ;;  %v712_v54 = vmul.f32 %v1933_v11, %v541_v44 }
 0x101   : > { %v492_v48 = vpop.f32.mrb[10].mxu0  ;;  %v544_v49 = vpop.f32.mrb[10].mxu1  ;;  %v655_v61 = vmul.f32 %v489_v43, %v1964_v16  ;;  %v705_v62 = vmul.f32 %v699_v58, %v489_v43  ;;  %v656_v13 = vmul.f32 %v541_v44, %v1964_v16  ;;  %v706_v14 = vmul.f32 %v699_v58, %v541_v44 }
 0x102   : > { %679 = vrot.lane.b32.xlu0 %v664_v42, %s1810_s5  ;;  %681 = vrot.lane.b32.xlu1 %v665_v46, %s1810_s5  ;;  %v1571_v50 = vpop.f32.mrb[11].mxu0  ;;  %v1579_v51 = vpop.f32.mrb[11].mxu1 }
 0x106   : > { %727 = vrot.lane.b32.xlu1 %v711_v52, %s1809_s7 }
 0x108   : > { %v593_v34 = vpop.f32.mrb[12].mxu0  ;;  %v2080_v49 = vpop.f32.mrb[12].mxu1 }
 0x109   : > { %v983_v47 = vpack.c.bf16 %v593_v34, %v593_v34  ;;  %v1586_v48 = vpop.f32.mrb[13].mxu0  ;;  %v1594_v51 = vpop.f32.mrb[13].mxu1  ;;  %v1168_v34 = vld [vmem:[%s2190_s2] sm:$0xf] }
 0x10a   : > { %683 = vrot.lane.b32.xlu1 %v666_v53, %s1810_s5  ;;  %v596_v50 = vpop.f32.mrb[14].mxu0  ;;  %s1378_s5 = sshll.u32 %s188_s30, 4  ;;  %s2147_s5 = int_to_ptr.vmem [resolvable:$true] %s1378_s5 }
 0x10b   : > { %v990_v52 = vsel %vm988_vm4, %v983_v47, 0  ;;  %v1587_v53 = vpop.f32.mrb[15].mxu0  ;;  %s1743_s10 = scalar_lea.vmem %s2147_s5, 128 }
 0x10c   : > { %v1169_v53 = vld [vmem:[%s2190_s2 + $0x4] sm:$0xf]  ;;  %p1744_p11 = scmp.ne.s32.totalorder %s2147_s5, %s1743_s10 }
 0x10e   : > { %729 = vrot.lane.b32.xlu1 %v712_v54, %s1809_s7  ;;  %v648_v54 = vpop.f32.mrb[14].mxu1  ;;  %p1745_p12 = pnand %p1744_p11, %p1875_p5 }
 0x10f   : > { %v1222_v54 = vsel %vm988_vm4, %v1169_v53, 0 }
 0x110   : > { %p1746_p13 = pneg %p1745_p12 }
 0x112   : > { %721 = vrot.lane.b32.xlu1 %v708_v55, %s1809_s7  ;;  %v1595_v55 = vpop.f32.mrb[15].mxu1 }
 0x113   : > { %v1170_v55 = vld [vmem:[%s2190_s2 + $0x8] sm:$0xf] }
 0x116   : > { %723 = vrot.lane.b32.xlu1 %v709_v56, %s1809_s7 }
 0x11a   : > { %725 = vrot.lane.b32.xlu1 %v710_v57, %s1809_s7  ;;  %s1811_s7 = smov [#allocation2]  }
 0x11b   : > { %s1747_s11 = sshll.u32 %s1811_s7, 4  ;;  %s1748_s11 = int_to_ptr.vmem [resolvable:$false] %s1747_s11 }
 0x11c   : > { %s1749_s12 = scalar_lea.vmem %s1748_s11, 256  ;;  %p1750_p0 = scmp.lt.s32.totalorder %s2147_s5, %s1748_s11 }
 0x11d   : > { %p1751_p1 = scmp.lt.s32.totalorder %s1749_s12, %s1743_s10 }
 0x11f   : > { %p1752_p2 = por %p1751_p1, %p1750_p0 }
 0x121   : > { %p1753_p3 = pnand %p1752_p2, %p1746_p13 }
 0x164   : > { %v674_v59 = vpop.permute.xlu0 %673 }
 0x165   : > { %v691_v12 = vsub.f32 %v651_v8, %v674_v59 }
 0x168   : > { %v720_v63 = vpop.permute.xlu0 %719 }
 0x169   : > { %v737_v9 = vadd.f32 %v720_v63, %v701_v4 }
 0x16b   : > { %v744_v17 = vsel %vm743_vm2, %v691_v12, %v737_v9 }
 0x16c   : > { %v676_v10 = vpop.permute.xlu0 %675  ;;  %v750_v24 = vpack.c.bf16 %v744_v17, %v744_v17 }
 0x16d   : > { %v692_v28 = vsub.f32 %v652_v18, %v676_v10 }
 0x170   : > { %v678_v25 = vpop.permute.xlu0 %677 }
 0x171   : > { %v693_v37 = vsub.f32 %v653_v31, %v678_v25 }
 0x174   : > { %v682_v60 = vpop.permute.xlu1 %681  ;;  %v680_v39 = vpop.permute.xlu0 %679 }
 0x175   : > { %v695_v2 = vsub.f32 %v655_v61, %v682_v60  ;;  %v694_v44 = vsub.f32 %v654_v40, %v680_v39  ;;  %v984_v40 = vpack.c.bf16 %v2080_v49, %v2080_v49  ;;  %v1176_v49 = vsel %vm988_vm4, %v1168_v34, 0 }
 0x178   : > { %v728_v0 = vpop.permute.xlu1 %727 }
 0x179   : > { %v741_v3 = vadd.f32 %v728_v0, %v705_v62 }
 0x17b   : > { %v748_v5 = vsel %vm743_vm2, %v695_v2, %v741_v3 }
 0x17c   : > { %v754_v6 = vpack.c.bf16 %v748_v5, %v748_v5  ;;  %v684_v7 = vpop.permute.xlu1 %683 }
 0x17d   : > { %v696_v20 = vsub.f32 %v656_v13, %v684_v7 }
 0x17e   : > { %v761_v11 = vsel %vm756_vm3, %v754_v6, 0 }
 0x17f   : > { %1597 = vmatpush3.bf16.xpose.msra.mxu0 %v761_v11  ;;  %1603 = vmatpush3.bf16.xpose.msra.mxu1 %v761_v11 }
 0x180   : > { %v730_v15 = vpop.permute.xlu1 %729  ;;  %1608 = vmatprep.subr.bf16.mxu0 %v1807_v1  ;;  %1614 = vmatprep.subr.bf16.mxu1 %v1807_v1 }
 0x181   : > { %v742_v21 = vadd.f32 %v730_v15, %v706_v14 }
 0x183   : > { %v749_v22 = vsel %vm743_vm2, %v696_v20, %v742_v21 }
 0x184   : > { %v755_v26 = vpack.c.bf16 %v749_v22, %v749_v22  ;;  %v722_v27 = vpop.permute.xlu1 %721 }
 0x185   : > { %v738_v29 = vadd.f32 %v722_v27, %v702_v23 }
 0x186   : > { %1599 = vmatmul.mubr.msk.bf16.vlgmr.msra.gmra.mrb[16].mxu0 %vm756_vm3, %v750_v24  ;;  %v850_v30 = vsel %vm756_vm3, %v755_v26, 0 }
 0x187   : > { %v745_v32 = vsel %vm743_vm2, %v692_v28, %v738_v29  ;;  %1609 = vmatpush3.bf16.xpose.msra.mxu0 %v850_v30  ;;  %1610 = vmatprep.mubr.msk.bf16.mxu0 %vm1808_vm0, %v1807_v1 }
 0x188   : > { %v751_v19 = vpack.c.bf16 %v745_v32, %v745_v32  ;;  %v724_v36 = vpop.permute.xlu1 %723  ;;  %1620 = vmatprep.subr.bf16.mxu0 %v1807_v1 }
 0x189   : > { %v739_v38 = vadd.f32 %v724_v36, %v703_v35 }
 0x18a   : > { %1605 = vmatmul.mubr.msk.bf16.vlgmr.msra.gmra.mrb[16].mxu1 %vm756_vm3, %v751_v19 }
 0x18b   : > { %v746_v41 = vsel %vm743_vm2, %v693_v37, %v739_v38  ;;  %1615 = vmatpush3.bf16.xpose.msra.mxu1 %v850_v30  ;;  %1616 = vmatprep.mubr.msk.bf16.mxu1 %vm1808_vm0, %v1807_v1 }
 0x18c   : > { %v752_v42 = vpack.c.bf16 %v746_v41, %v746_v41  ;;  %v726_v43 = vpop.permute.xlu1 %725  ;;  %1626 = vmatprep.subr.bf16.mxu1 %v1807_v1 }
 0x18d   : > { %v740_v45 = vadd.f32 %v726_v43, %v704_v33 }
 0x18e   : > { %1611 = vmatmul.mubr.msk.bf16.vlgmr.msra.gmra.mrb[20].mxu0 %vm756_vm3, %v752_v42 }
 0x18f   : > { %v747_v46 = vsel %vm743_vm2, %v694_v44, %v740_v45  ;;  %1622 = vmatprep.mubr.msk.bf16.mxu0 %vm1808_vm0, %v1807_v1  ;;  %1621 = vmatpush3.bf16.msra.mxu0 %v990_v52  ;;  %v1079_v44 = vsel %vm988_vm4, %v984_v40, 0 }
 0x190   : > { %v753_v16 = vpack.c.bf16 %v747_v46, %v747_v46  ;;  %1632 = vmatprep.subr.bf16.mxu0 %v1807_v1 }
 0x192   : > { %1617 = vmatmul.mubr.msk.bf16.vlgmr.msra.gmra.mrb[20].mxu1 %vm756_vm3, %v753_v16 }
 0x193   : > { %1628 = vmatprep.mubr.msk.bf16.mxu1 %vm1808_vm0, %v1807_v1  ;;  %1627 = vmatpush3.bf16.msra.mxu1 %v990_v52 }
 0x194   : > { %1638 = vmatprep.subr.bf16.mxu1 %v1807_v1 }
 0x259   : > { %v797_v56 = vpop.f32.mrb[16].mxu0 }
 0x25a   : > { %v1600_v57 = vpop.f32.mrb[17].mxu0  ;;  %v935_v58 = vsel %vm756_vm3, %v797_v56, -inf }
 0x25b   : > { %936 = vmax.xlane.f32.xlu0 %v935_v58  ;;  %v800_v59 = vpop.f32.mrb[18].mxu0 }
 0x25c   : > { %v1601_v60 = vpop.f32.mrb[19].mxu0  ;;  %v1268_v59 = vsel %vm988_vm4, %v1170_v55, 0 }
 0x25d   : > { %v840_v61 = vpop.f32.mrb[16].mxu1 }
 0x25e   : > { %v1606_v62 = vpop.f32.mrb[17].mxu1  ;;  %v938_v63 = vsel %vm756_vm3, %v840_v61, -inf }
 0x25f   : > { %939 = vmax.xlane.f32.xlu1 %v938_v63  ;;  %v843_v0 = vpop.f32.mrb[18].mxu1 }
 0x260   : > { %v1607_v2 = vpop.f32.mrb[19].mxu1 }
 0x261   : > { %v886_v3 = vpop.f32.mrb[20].mxu0 }
 0x262   : > { %v1612_v4 = vpop.f32.mrb[21].mxu0  ;;  %v941_v5 = vsel %vm756_vm3, %v886_v3, -inf }
 0x263   : > { %942 = vmax.xlane.f32.xlu0 %v941_v5  ;;  %v889_v6 = vpop.f32.mrb[22].mxu0 }
 0x264   : > { %v1613_v7 = vpop.f32.mrb[23].mxu0 }
 0x265   : > { %v929_v8 = vpop.f32.mrb[20].mxu1 }
 0x266   : > { %v1618_v9 = vpop.f32.mrb[21].mxu1  ;;  %v944_v10 = vsel %vm756_vm3, %v929_v8, -inf }
 0x267   : > { %v932_v11 = vpop.f32.mrb[22].mxu1  ;;  %945 = vmax.xlane.f32.xlu0 %v944_v10 }
 0x268   : > { %v1619_v12 = vpop.f32.mrb[23].mxu1 }
 0x2e8   : > { %v937_v13 = vpop.xlane.xlu0 %936 }
 0x2e9   : > { %v947_v14 = vsub.f32 %v797_v56, %v937_v13 }
 0x2eb   : > { %v951_v15 = vmul.f32 1.442695, %v947_v14 }
 0x2ec   : > { %v940_v17 = vpop.xlane.xlu1 %939 }
 0x2ed   : > { %1727 = vpow2.f32 %v951_v15  ;;  %v948_v20 = vsub.f32 %v840_v61, %v940_v17  ;;  %v1171_v61 = vld [vmem:[%s2190_s2 + $0xc] sm:$0xf] }
 0x2ef   : > { %v953_v21 = vmul.f32 1.442695, %v948_v20 }
 0x2f0   : > { %v943_v18 = vpop.xlane.xlu0 %942 }
 0x2f1   : > { %1729 = vpow2.f32 %v953_v21  ;;  %v949_v22 = vsub.f32 %v886_v3, %v943_v18  ;;  %v1314_v3 = vsel %vm988_vm4, %v1171_v61, 0 }
 0x2f3   : > { %v955_v23 = vmul.f32 1.442695, %v949_v22 }
 0x2f4   : > { %v946_v24 = vpop.xlane.xlu0 %945 }
 0x2f5   : > { %1731 = vpow2.f32 %v955_v23  ;;  %v950_v25 = vsub.f32 %v929_v8, %v946_v24 }
 0x2f7   : > { %v1728_v26 = vpop.eup %1727  ;;  %v957_v27 = vmul.f32 1.442695, %v950_v25 }
 0x2f8   : > { %v959_v28 = vsel %vm756_vm3, %v1728_v26, 0.0 }
 0x2f9   : > { %1733 = vpow2.f32 %v957_v27  ;;  %960 = vadd.xlane.f32.xlu1 %v959_v28 }
 0x2fb   : > { %v1730_v29 = vpop.eup %1729 }
 0x2fc   : > { %v962_v30 = vsel %vm756_vm3, %v1730_v29, 0.0 }
 0x2fd   : > { %963 = vadd.xlane.f32.xlu0 %v962_v30 }
 0x2ff   : > { %v1732_v31 = vpop.eup %1731 }
 0x300   : > { %v965_v32 = vsel %vm756_vm3, %v1732_v31, 0.0 }
 0x301   : > { %966 = vadd.xlane.f32.xlu1 %v965_v32 }
 0x303   : > { %v1734_v35 = vpop.eup %1733 }
 0x304   : > { %v968_v19 = vsel %vm756_vm3, %v1734_v35, 0.0 }
 0x305   : > { %969 = vadd.xlane.f32.xlu0 %v968_v19 }
 0x386   : > { %v961_v36 = vpop.xlane.xlu1 %960 }
 0x387   : > { %1735 = vrcp.f32 %v961_v36 }
 0x38a   : > { %v964_v37 = vpop.xlane.xlu0 %963 }
 0x38b   : > { %1737 = vrcp.f32 %v964_v37 }
 0x38e   : > { %v967_v38 = vpop.xlane.xlu1 %966 }
 0x38f   : > { %1739 = vrcp.f32 %v967_v38 }
 0x391   : > { %v1736_v39 = vpop.eup %1735 }
 0x392   : > { %v975_v41 = vmul.f32 %v1736_v39, %v1728_v26  ;;  %v970_v33 = vpop.xlane.xlu0 %969 }
 0x393   : > { %1741 = vrcp.f32 %v970_v33 }
 0x394   : > { %v979_v42 = vpack.c.bf16 %v975_v41, %v975_v41 }
 0x395   : > { %v1738_v43 = vpop.eup %1737 }
 0x396   : > { %v976_v45 = vmul.f32 %v1738_v43, %v1730_v29  ;;  %1623 = vmatmul.mubr.msk.bf16.vlgmr.msra.gmra.mrb[24].mxu0 %vm756_vm3, %v979_v42 }
 0x397   : > { %1633 = vmatpush3.bf16.msra.mxu0 %v1079_v44  ;;  %1634 = vmatprep.mubr.msk.bf16.mxu0 %vm1808_vm0, %v1807_v1 }
 0x398   : > { %v980_v46 = vpack.c.bf16 %v976_v45, %v976_v45  ;;  %1644 = vmatprep.subr.bf16.mxu0 %v1807_v1 }
 0x399   : > { %v1740_v16 = vpop.eup %1739 }
 0x39a   : > { %v977_v47 = vmul.f32 %v1740_v16, %v1732_v31  ;;  %1629 = vmatmul.mubr.msk.bf16.vlgmr.msra.gmra.mrb[24].mxu1 %vm756_vm3, %v980_v46 }
 0x39b   : > { %1639 = vmatpush3.bf16.msra.mxu1 %v1079_v44  ;;  %1640 = vmatprep.mubr.msk.bf16.mxu1 %vm1808_vm0, %v1807_v1 }
 0x39c   : > { %v981_v48 = vpack.c.bf16 %v977_v47, %v977_v47  ;;  %1650 = vmatprep.subr.bf16.mxu1 %v1807_v1 }
 0x39d   : > { %v1742_v50 = vpop.eup %1741 }
 0x39e   : > { %v978_v51 = vmul.f32 %v1742_v50, %v1734_v35  ;;  %1635 = vmatmul.mubr.msk.bf16.vlgmr.msra.gmra.mrb[28].mxu0 %vm756_vm3, %v981_v48 }
 0x39f   : > { %1645 = vmatpush3.bf16.msra.mxu0 %v1176_v49  ;;  %1646 = vmatprep.mubr.msk.bf16.mxu0 %vm1808_vm0, %v1807_v1 }
 0x3a0   : > { %v982_v52 = vpack.c.bf16 %v978_v51, %v978_v51  ;;  %1656 = vmatprep.subr.bf16.mxu0 %v1807_v1 }
 0x3a2   : > { %1641 = vmatmul.mubr.msk.bf16.vlgmr.msra.gmra.mrb[28].mxu1 %vm756_vm3, %v982_v52 }
 0x3a3   : > { %1652 = vmatprep.mubr.msk.bf16.mxu1 %vm1808_vm0, %v1807_v1  ;;  %1651 = vmatpush3.bf16.msra.mxu1 %v1222_v54 }
 0x3a4   : > { %1662 = vmatprep.subr.bf16.mxu1 %v1807_v1 }
 0x469   : > { %v1026_v56 = vpop.f32.mrb[24].mxu0 }
 0x46a   : > { %v1164_v57 = vpack.c.bf16 %v1026_v56, %v1026_v56  ;;  %v1624_v58 = vpop.f32.mrb[25].mxu0 }
 0x46b   : > { %v1029_v60 = vpop.f32.mrb[26].mxu0 }
 0x46c   : > { %v1625_v62 = vpop.f32.mrb[27].mxu0  ;;  %1647 = vmatmul.mubr.msk.bf16.vlgmr.msra.gmra.mrb[32].mxu0 %vm756_vm3, %v1164_v57 }
 0x46d   : > { %v1069_v63 = vpop.f32.mrb[24].mxu1  ;;  %1657 = vmatpush3.bf16.msra.mxu0 %v1268_v59  ;;  %1658 = vmatprep.mubr.msk.bf16.mxu0 %vm1808_vm0, %v1807_v1 }
 0x46e   : > { %v1165_v0 = vpack.c.bf16 %v1069_v63, %v1069_v63  ;;  %v1630_v2 = vpop.f32.mrb[25].mxu1 }
 0x46f   : > { %v1072_v4 = vpop.f32.mrb[26].mxu1 }
 0x470   : > { %v1631_v5 = vpop.f32.mrb[27].mxu1  ;;  %1653 = vmatmul.mubr.msk.bf16.vlgmr.msra.gmra.mrb[32].mxu1 %vm756_vm3, %v1165_v0 }
 0x471   : > { %v1115_v6 = vpop.f32.mrb[28].mxu0  ;;  %1663 = vmatpush3.bf16.msra.mxu1 %v1314_v3  ;;  %1664 = vmatprep.mubr.msk.bf16.mxu1 %vm1808_vm0, %v1807_v1 }
 0x472   : > { %v1166_v7 = vpack.c.bf16 %v1115_v6, %v1115_v6  ;;  %v1636_v8 = vpop.f32.mrb[29].mxu0 }
 0x473   : > { %v1118_v9 = vpop.f32.mrb[30].mxu0 }
 0x474   : > { %v1637_v10 = vpop.f32.mrb[31].mxu0  ;;  %1659 = vmatmul.mubr.msk.bf16.vlgmr.msra.gmra.mrb[36].mxu0 %vm756_vm3, %v1166_v7 }
 0x475   : > { %v1158_v11 = vpop.f32.mrb[28].mxu1 }
 0x476   : > { %v1167_v12 = vpack.c.bf16 %v1158_v11, %v1158_v11  ;;  %v1642_v13 = vpop.f32.mrb[29].mxu1 }
 0x477   : > { %v1161_v14 = vpop.f32.mrb[30].mxu1 }
 0x478   : > { %v1643_v15 = vpop.f32.mrb[31].mxu1  ;;  %1665 = vmatmul.mubr.msk.bf16.vlgmr.msra.gmra.mrb[36].mxu1 %vm756_vm3, %v1167_v12 }
 0x53f   : > { %v1212_v17 = vpop.f32.mrb[32].mxu0 }
 0x540   : > { %v1648_v20 = vpop.f32.mrb[33].mxu0  ;;  %v1356_v22 = vsel %vm243_vm1, %v1212_v17, 0.0 }
 0x541   : > { %v1215_v21 = vpop.f32.mrb[34].mxu0 }
 0x542   : > { %v1649_v18 = vpop.f32.mrb[35].mxu0 }
 0x543   : > { %v1258_v1 = vpop.f32.mrb[32].mxu1 }
 0x544   : > { %v1357_v23 = vsel %vm243_vm1, %v1258_v1, 0.0  ;;  %v1654_v24 = vpop.f32.mrb[33].mxu1 }
 0x545   : > { %v1358_v25 = vadd.f32 %v1357_v23, %v1356_v22  ;;  %v1261_v26 = vpop.f32.mrb[34].mxu1 }
 0x546   : > { %v1655_v27 = vpop.f32.mrb[35].mxu1 }
 0x547   : > { %v1304_v28 = vpop.f32.mrb[36].mxu0 }
 0x548   : > { %v1359_v29 = vsel %vm243_vm1, %v1304_v28, 0.0  ;;  %v1660_v30 = vpop.f32.mrb[37].mxu0 }
 0x549   : > { %v1360_v31 = vadd.f32 %v1359_v29, %v1358_v25  ;;  %v1307_v32 = vpop.f32.mrb[38].mxu0 }
 0x54a   : > { %v1661_v35 = vpop.f32.mrb[39].mxu0 }
 0x54b   : > { %v1350_v19 = vpop.f32.mrb[36].mxu1 }
 0x54c   : > { %v1361_v36 = vsel %vm243_vm1, %v1350_v19, 0.0  ;;  %v1666_v37 = vpop.f32.mrb[37].mxu1 }
 0x54d   : > { %v1362_v38 = vadd.f32 %v1361_v36, %v1360_v31  ;;  %v1353_v39 = vpop.f32.mrb[38].mxu1 }
 0x54e   : > { %v1667_v40 = vpop.f32.mrb[39].mxu1 }
 0x54f   : > { %1363 = vst.msk [vmem:[%s188_s30] sm:$0xff] %vm243_vm1, %v1362_v38 }
 0x550   : > { %1756 = shalt.err (!%p1753_p3)
}
 0x551   : > { %s1757_s13 = scalar_lea.hbm %s2145_s9, 128  ;;  %s1761_s22 = scalar_lea.hbm %s2192_s4, 256 }
 0x552   : > { %p1758_p4 = scmp.ne.s32.totalorder %s2145_s9, %s1757_s13  ;;  %p1762_p9 = scmp.lt.u32.totalorder %s2145_s9, %s2192_s4 }
 0x553   : > { %p1763_p10 = scmp.lt.u32.totalorder %s1761_s22, %s1757_s13  ;;  %p1765_p12 = scmp.lt.u32.totalorder %s1757_s13, %s2145_s9 }
 0x554   : > { %p1759_p7 = pnand %p1758_p4, %p1875_p5 }
 0x555   : > { %p1764_p11 = por %p1763_p10, %p1762_p9 }
 0x556   : > { %p1760_p8 = pneg %p1759_p7 }
 0x557   : > { %p1766_p13 = por %p1765_p12, %p1764_p11 }
 0x559   : > { %p1767_p0 = pnand %p1766_p13, %p1760_p8 }
 0x55b   : > { %1770 = shalt.err (!%p1767_p0)
}
 0x55c   : > { %1668 = dma.vmem_to_hbm [thread:$0]  (%p1875_p5), %s2147_s5, 128, %s2145_s9, %s1365_s19  }
 0x55d PF: > { %p1674_p1 = scmp.ge.s32.totalorder %s1805_s18, 2  ;;  %s1390_s28 = sand.u32 1, %s1793_s15  }
 0x55e   : > { %s1391_s29 = scalar_lea.sflag [#allocation3], %s1390_s28 }
 0x55f   : > { %p1671_p2 = pnand %p1674_p1, %p1879_p6 }
 0x561   : > { %1788 = dma.done.wait (!%p1671_p2), %s1391_s29, 128  }
 0x562   : > { %1790 = vsyncadd (!%p1671_p2), %s1391_s29, 4294967168  ;;  %p14_p3 = scmp.ge.s32.totalorder %s1862_s21, 4   ;;  %s2195_s15 = smov %s1797_s16 }
 0x563   : > { %s2196_s16 = smov %s1801_s17  ;;  %s2197_s17 = smov %s1873_s24 }
 0x564   : > { %s2198_s18 = smov %s1862_s21  ;;  %16 = sbr.rel (!%p14_p3) target bundleno = 3 (0x3), region = 72 }
 0x56b   :  { %1396 = vsyncpa [#allocation3], 1 }
 0x56c   :  { %1398 = vsyncpa [#allocation3 + $0x1], 1 }

</bundles_post_ra>
